<compile_context>
chip_gen: v7x
topology: tpu7x:2x2x1
jax: 0.10.0
libtpu: 0.0.40
codegen_flags: <defaults>
</compile_context>

<pallas_src>
import functools

import jax
import jax.numpy as jnp
from jax.experimental import pallas as pl
from jax.experimental.pallas import tpu as pltpu


# --------------------------------------------------------------------------
# Kernel
# --------------------------------------------------------------------------
def _make_ensemble_kernel(method: str, num_models: int, compute_dtype):
    """Kernel body: accumulate fused logit-diff matmul, combine on last step."""
    inv_m = 1.0 / num_models

    def kernel(x_ref, w_ref, v_ref, out_ref, acc_ref):
        k = pl.program_id(1)

        @pl.when(k == 0)
        def _init():
            acc_ref[...] = jnp.zeros_like(acc_ref)

        # In-kernel cast keeps HBM traffic at the stored dtype (4 B/elem for
        # f32 inputs); the cast is a VPU op hidden under the DMA.
        x = x_ref[...].astype(compute_dtype)
        acc_ref[...] += jnp.dot(x, w_ref[...],
                                preferred_element_type=jnp.float32)

        @pl.when(k == pl.num_programs(1) - 1)
        def _finalize():
            acc = acc_ref[...]                               # (tb, M) = l1 - l0 (no bias)
            if method == 'vote':
                # p1_m >= thr_m  <=>  acc_m >= logit(thr_m) - b_diff_m  (= v_ref)
                d = (acc >= v_ref[...]).astype(jnp.float32)  # (tb, M)
                p1 = jnp.sum(d, axis=-1, keepdims=True) * inv_m
                p0 = 1.0 - p1
            else:
                diff = acc + v_ref[...]                      # add b_diff
                # K=2 softmax == sigmoid of the logit difference (exact).
                sig = 1.0 / (1.0 + jnp.exp(-diff))           # (tb, M), f32 epilogue
                if method == 'max':
                    p1 = jnp.max(sig, axis=-1, keepdims=True)
                    p0 = 1.0 - jnp.min(sig, axis=-1, keepdims=True)
                else:  # 'average'
                    p1 = jnp.sum(sig, axis=-1, keepdims=True) * inv_m
                    p0 = 1.0 - p1

            # Assemble the (tb, 2) output [p0 | p1] with a single store.
            col = jax.lax.broadcasted_iota(jnp.int32, out_ref.shape, 1)
            out_ref[...] = jnp.where(col == 1, p1, p0).astype(out_ref.dtype)

    return kernel


# --------------------------------------------------------------------------
# Tiling plan
# --------------------------------------------------------------------------
_TB_CAP = 512    # batch tile: HBM-roofline utilization plateaus ~here; >=2 steps for B>512
_TD_CAP = 4096   # reduction tile: 2 * 512 * 4096 * 4B = 16 MiB of double-buffered x


def _round_up(x, m):
    return (x + m - 1) // m * m


def _choose_tiles(B, D):
    """Returns (tb, td, d_pad). d_pad>0 only in the rare no-divisor fallback."""
    tb = B if B <= _TB_CAP else _TB_CAP
    if D <= _TD_CAP:
        return tb, D, 0
    # Largest lane-aligned (multiple of 128) tile <= cap that divides D.
    for td in range(_TD_CAP, 0, -128):
        if D % td == 0:
            return tb, td, 0
    # Fallback: zero-pad the reduction dim (zeros contribute nothing to the dot).
    return tb, _TD_CAP, _round_up(D, _TD_CAP) - D


# --------------------------------------------------------------------------
# One-time parameter preparation (hoisted out of the per-call path)
# --------------------------------------------------------------------------
def prepare_ensemble(weights, biases, thresholds, *, compute_dtype=jnp.float32):
    """weights (M, D, 2), biases (M, 2), thresholds (M,) -> fused params."""
    w_diff = jnp.transpose(weights[:, :, 1] - weights[:, :, 0])          # (D, M)
    w_diff = w_diff.astype(compute_dtype)
    b_diff = (biases[:, 1] - biases[:, 0]).reshape(1, -1).astype(jnp.float32)
    # Guard exact-endpoint thresholds (logit(0/1) = +-inf); behavior matches the
    # reference for thr in (0, 1).
    thr = jnp.clip(thresholds.astype(jnp.float32), 1e-7, 1.0 - 1e-7)
    t_logit = (jnp.log(thr) - jnp.log1p(-thr)).reshape(1, -1)
    t_eff = (t_logit - b_diff).astype(jnp.float32)                       # fold bias into vote threshold
    return {'w_diff': w_diff, 'b_diff': b_diff, 't_eff': t_eff}


# --------------------------------------------------------------------------
# Forward
# --------------------------------------------------------------------------
@functools.partial(jax.jit, static_argnames=('method', 'compute_dtype'))
def ensemble_forward(x, params, *, method='average', compute_dtype=jnp.float32):
    """x: (B, C, H, W) -> (B, 2) combined probabilities."""
    w = params['w_diff']                                   # (D, M)
    v = params['t_eff'] if method == 'vote' else params['b_diff']   # (1, M) f32
    D, M = w.shape

    B = x.shape[0]
    x_flat = x.reshape(B, -1)                              # stored dtype; cast in-kernel
    assert x_flat.shape[1] == D, (x_flat.shape, D)

    tb, td, d_pad = _choose_tiles(B, D)
    if d_pad:
        # Rare fallback (D > cap with no lane-aligned divisor): zero-pad K.
        x_flat = jnp.pad(x_flat, ((0, 0), (0, d_pad)))
        w = jnp.pad(w, ((0, d_pad), (0, 0)))
        D = D + d_pad
    nb = pl.cdiv(B, tb)
    nd = D // td

    x_item = jnp.dtype(x_flat.dtype).itemsize
    w_item = jnp.dtype(w.dtype).itemsize
    need = (2 * tb * td * x_item          # double-buffered activation tiles
            + 2 * td * M * w_item         # double-buffered weight tiles
            + 2 * tb * 2 * 4              # output tiles
            + 2 * M * 4                   # bias / threshold vector
            + tb * M * 4)                 # accumulator scratch
    vmem_bytes = int(max(need + (4 << 20), 16 << 20))

    kernel = _make_ensemble_kernel(method, M, compute_dtype)

    return pl.pallas_call(
        kernel,
        out_shape=jax.ShapeDtypeStruct((B, 2), jnp.float32),
        grid=(nb, nd),
        in_specs=[
            pl.BlockSpec((tb, td), lambda b, k: (b, k)),   # activations
            pl.BlockSpec((td, M), lambda b, k: (k, 0)),    # fused weight-diff
            pl.BlockSpec((1, M), lambda b, k: (0, 0)),     # b_diff or t_eff
        ],
        out_specs=pl.BlockSpec((tb, 2), lambda b, k: (b, 0)),
        scratch_shapes=[pltpu.VMEM((tb, M), jnp.float32)],
        compiler_params=pltpu.CompilerParams(
            dimension_semantics=("parallel", "arbitrary"),
            vmem_limit_bytes=vmem_bytes),
        # TODO(synk): bump in_specs[0] to pipeline_mode=pl.Buffered(3) only if an
        # xprof trace shows exposed DMA gaps between grid steps.
    )(x_flat, w, v)


# --------------------------------------------------------------------------
# Plain-JAX reference mirroring the PyTorch forward
# --------------------------------------------------------------------------
def ensemble_reference(x, weights, biases, thresholds, method):
    B = x.shape[0]
    M = weights.shape[0]
    x_flat = x.reshape(B, -1).astype(jnp.float32)
    logits = jnp.einsum('bd,mdk->mbk', x_flat, weights) + biases[:, None, :]
    p = jax.nn.softmax(logits, axis=-1)                    # (M, B, K)
    if method == 'average':
        return p.mean(axis=0)
    elif method == 'max':
        return p.max(axis=0)
    elif method == 'vote':
        d = (p[:, :, 1] >= thresholds[:, None]).astype(jnp.float32)[..., None]
        disc = jnp.concatenate([1.0 - d, d], axis=-1)
        return disc.sum(axis=0) / M
    raise ValueError(method)


if __name__ == "__main__":
    # Small deterministic setup: 3 member models, 2 classes, 4x16x16 inputs.
    B, C, H, W = 2, 4, 16, 16
    M, K = 3, 2
    D = C * H * W

    key = jax.random.PRNGKey(0)
    kx, kw, kb = jax.random.split(key, 3)
    x = jax.random.normal(kx, (B, C, H, W), dtype=jnp.float32)
    weights = 0.02 * jax.random.normal(kw, (M, D, K), dtype=jnp.float32)
    biases = 0.1 * jax.random.normal(kb, (M, K), dtype=jnp.float32)
    thresholds = jnp.array([0.5, 0.4, 0.6], dtype=jnp.float32)

    # f32 path (exact sigmoid -> matches the reference softmax tightly).
    params_f32 = prepare_ensemble(weights, biases, thresholds)
    for method in ('average', 'max', 'vote'):
        out = jax.block_until_ready(ensemble_forward(x, params_f32, method=method))
        ref = ensemble_reference(x, weights, biases, thresholds, method)
        assert out.shape == (B, K), (method, out.shape)
        assert jnp.allclose(out, ref, atol=1e-5), (method, out, ref)

    # bf16 MXU-operand path: x stays f32 in HBM, cast inside the kernel;
    # weights prepared once in bf16; accumulation + epilogue stay f32.
    params_bf16 = prepare_ensemble(weights, biases, thresholds,
                                   compute_dtype=jnp.bfloat16)
    out_bf = jax.block_until_ready(
        ensemble_forward(x, params_bf16, method='average',
                         compute_dtype=jnp.bfloat16))
    ref_avg = ensemble_reference(x, weights, biases, thresholds, 'average')
    assert out_bf.shape == (B, K)
    assert jnp.allclose(out_bf, ref_avg, atol=3e-2), (out_bf, ref_avg)

    # Larger batch: exercises the multi-step (parallel, arbitrary) grid and a
    # partial (masked) last batch tile.
    B2 = 1100
    x2 = jax.random.normal(jax.random.PRNGKey(1), (B2, C, H, W), dtype=jnp.float32)
    out2 = jax.block_until_ready(ensemble_forward(x2, params_f32, method='average'))
    ref2 = ensemble_reference(x2, weights, biases, thresholds, 'average')
    assert out2.shape == (B2, K)
    assert jnp.allclose(out2, ref2, atol=1e-5)

    print("KERNEL_OK")
</pallas_src>

<mosaic_0001>
module attributes {stable_mosaic.version = 11 : i64} {
  func.func @kernel(%arg0: i32, %arg1: i32, %arg2: memref<2x1024xf32, #tpu.memory_space<vmem>>, %arg3: memref<1024x3xf32, #tpu.memory_space<vmem>>, %arg4: memref<1x3xf32, #tpu.memory_space<vmem>>, %arg5: memref<2x2xf32, #tpu.memory_space<vmem>>, %arg6: memref<2x3xf32, #tpu.memory_space<vmem>>) attributes {dimension_semantics = [#tpu.dimension_semantics<parallel>, #tpu.dimension_semantics<arbitrary>], iteration_bounds = array<i64: 1, 1>, scalar_prefetch = 0 : i64, scratch_operands = 1 : i64, tpu.core_type = #tpu.core_type<tc>, window_params = [{transform_indices = @transform_0, window_bounds = array<i64: 2, 1024>}, {transform_indices = @transform_1, window_bounds = array<i64: 1024, 3>}, {pipeline_mode = #tpu.pipeline_mode<synchronous>, transform_indices = @transform_2, window_bounds = array<i64: 1, 3>}, {transform_indices = @transform_3, window_bounds = array<i64: 2, 2>}]} {
    %c0_i32 = arith.constant 0 : i32
    %0 = arith.cmpi eq, %arg1, %c0_i32 : i32
    %1 = arith.extui %0 : i1 to i32
    %c0_i32_0 = arith.constant 0 : i32
    %2 = arith.cmpi ne, %1, %c0_i32_0 : i32
    scf.if %2 {
      %cst_10 = arith.constant 0.000000e+00 : f32
      %12 = vector.broadcast %cst_10 : f32 to vector<2x3xf32>
      %c0_11 = arith.constant 0 : index
      %c0_12 = arith.constant 0 : index
      %13 = vector.load %arg6[%c0_11, %c0_12] : memref<2x3xf32, #tpu.memory_space<vmem>>, vector<2x3xf32>
      tpu.vector_store %arg6[%c0_11, %c0_12], %12 {strides = array<i32>} : memref<2x3xf32, #tpu.memory_space<vmem>>, vector<2x3xf32>,
    } else {
    }
    %c0 = arith.constant 0 : index
    %c0_1 = arith.constant 0 : index
    %3 = vector.load %arg2[%c0, %c0_1] : memref<2x1024xf32, #tpu.memory_space<vmem>>, vector<2x1024xf32>
    %c0_2 = arith.constant 0 : index
    %c0_3 = arith.constant 0 : index
    %4 = vector.load %arg6[%c0_2, %c0_3] : memref<2x3xf32, #tpu.memory_space<vmem>>, vector<2x3xf32>
    %c0_4 = arith.constant 0 : index
    %c0_5 = arith.constant 0 : index
    %5 = vector.load %arg3[%c0_4, %c0_5] : memref<1024x3xf32, #tpu.memory_space<vmem>>, vector<1024x3xf32>
    %cst = arith.constant dense<0.000000e+00> : vector<2x3xf32>
    %6 = tpu.matmul %3, %5, %cst {dimension_numbers = #tpu.dot_dimension_numbers<[1], [0], [0], [1], [0, 0, 1, 1], [], []>} : vector<2x1024xf32>, vector<1024x3xf32>, vector<2x3xf32> -> vector<2x3xf32>
    %7 = arith.addf %4, %6 : vector<2x3xf32>
    %c0_6 = arith.constant 0 : index
    %c0_7 = arith.constant 0 : index
    %8 = vector.load %arg6[%c0_6, %c0_7] : memref<2x3xf32, #tpu.memory_space<vmem>>, vector<2x3xf32>
    tpu.vector_store %arg6[%c0_6, %c0_7], %7 {strides = array<i32>} : memref<2x3xf32, #tpu.memory_space<vmem>>, vector<2x3xf32>,
    %c0_i32_8 = arith.constant 0 : i32
    %9 = arith.cmpi eq, %arg1, %c0_i32_8 : i32
    %10 = arith.extui %9 : i1 to i32
    %c0_i32_9 = arith.constant 0 : i32
    %11 = arith.cmpi ne, %10, %c0_i32_9 : i32
    scf.if %11 {
      %c0_10 = arith.constant 0 : index
      %c0_11 = arith.constant 0 : index
      %12 = vector.load %arg6[%c0_10, %c0_11] : memref<2x3xf32, #tpu.memory_space<vmem>>, vector<2x3xf32>
      %c0_12 = arith.constant 0 : index
      %c0_13 = arith.constant 0 : index
      %13 = vector.load %arg4[%c0_12, %c0_13] : memref<1x3xf32, #tpu.memory_space<vmem>>, vector<1x3xf32>
      %14 = vector.broadcast %13 : vector<1x3xf32> to vector<2x3xf32>
      %15 = arith.addf %12, %14 : vector<2x3xf32>
      %cst_14 = arith.constant 0.000000e+00 : f32
      %16 = vector.broadcast %cst_14 : f32 to vector<2x3xf32>
      %17 = arith.subf %16, %15 : vector<2x3xf32>
      %18 = math.exp %17 : vector<2x3xf32>
      %cst_15 = arith.constant 1.000000e+00 : f32
      %19 = vector.broadcast %cst_15 : f32 to vector<2x3xf32>
      %20 = arith.addf %19, %18 : vector<2x3xf32>
      %cst_16 = arith.constant 1.000000e+00 : f32
      %21 = vector.broadcast %cst_16 : f32 to vector<2x3xf32>
      %22 = arith.divf %21, %20 : vector<2x3xf32>
      %cst_17 = arith.constant dense<0.000000e+00> : vector<2xf32>
      %23 = vector.multi_reduction <add>, %22, %cst_17 [1] : vector<2x3xf32> to vector<2xf32>
      %24 = vector.shape_cast %23 : vector<2xf32> to vector<2x1xf32>
      %cst_18 = arith.constant 0.333333343 : f32
      %25 = vector.broadcast %cst_18 : f32 to vector<2x1xf32>
      %26 = arith.mulf %24, %25 : vector<2x1xf32>
      %cst_19 = arith.constant 1.000000e+00 : f32
      %27 = vector.broadcast %cst_19 : f32 to vector<2x1xf32>
      %28 = arith.subf %27, %26 : vector<2x1xf32>
      %29 = tpu.iota {dimensions = array<i32: 1>} : vector<2x2xi32>
      %c1_i32 = arith.constant 1 : i32
      %30 = vector.broadcast %c1_i32 : i32 to vector<2x2xi32>
      %31 = arith.cmpi eq, %29, %30 : vector<2x2xi32>
      %32 = vector.shape_cast %26 : vector<2x1xf32> to vector<2x1xf32>
      %33 = vector.broadcast %32 : vector<2x1xf32> to vector<2x2xf32>
      %34 = vector.shape_cast %28 : vector<2x1xf32> to vector<2x1xf32>
      %35 = vector.broadcast %34 : vector<2x1xf32> to vector<2x2xf32>
      %36 = arith.select %31, %33, %35 : vector<2x2xi1>, vector<2x2xf32>
      %c0_20 = arith.constant 0 : index
      %c0_21 = arith.constant 0 : index
      %37 = vector.load %arg5[%c0_20, %c0_21] : memref<2x2xf32, #tpu.memory_space<vmem>>, vector<2x2xf32>
      tpu.vector_store %arg5[%c0_20, %c0_21], %36 {strides = array<i32>} : memref<2x2xf32, #tpu.memory_space<vmem>>, vector<2x2xf32>,
    } else {
    }
    return
  }
  func.func @transform_0(%arg0: i32, %arg1: i32) -> (i32, i32) {
    %c0_i32 = arith.constant 0 : i32
    return %arg0, %arg1 : i32, i32
  }
  func.func @transform_1(%arg0: i32, %arg1: i32) -> (i32, i32) {
    %c0_i32 = arith.constant 0 : i32
    %c0_i32_0 = arith.constant 0 : i32
    return %arg1, %c0_i32 : i32, i32
  }
  func.func @transform_2(%arg0: i32, %arg1: i32) -> (i32, i32) {
    %c0_i32 = arith.constant 0 : i32
    %c0_i32_0 = arith.constant 0 : i32
    %c0_i32_1 = arith.constant 0 : i32
    return %c0_i32, %c0_i32_0 : i32, i32
  }
  func.func @transform_3(%arg0: i32, %arg1: i32) -> (i32, i32) {
    %c0_i32 = arith.constant 0 : i32
    %c0_i32_0 = arith.constant 0 : i32
    return %arg0, %c0_i32 : i32, i32
  }
}

</mosaic_0001>

<bundles_post_ra>
// kernel: ensemble_forward.1
= control target key start
LH: loop header
LB: loop body
LE: loop exit
PB: predicated region body
PF: predicated region fallthrough
CT: control target
= control target key end

     0   :  { %v824_v47 = vmov 1983009808   ;;  %v158_v49 = vlaneseq  ;;  %s1268_s0 = inlined_call_operand.vmem [shape: f32[2,1024], index: 0, kind: input, shape index: {}]   ;;  %s1269_s1 = inlined_call_operand.vmem [shape: f32[1024,3], index: 1, kind: input, shape index: {}]   ;;  %s1270_s2 = inlined_call_operand.vmem [shape: f32[1,3], index: 2, kind: input, shape index: {}]   ;;  %s1271_s3 = inlined_call_operand.hbm [shape: f32[2,2], index: 3, kind: output, shape index: {}]  }
   0x1   :  { %v40_v0 = vld [vmem:[%s1269_s1 + $0x80] sm:$0xff]  ;;  %v41_v1 = vld [vmem:[%s1269_s1 + $0x88] sm:$0xff]  ;;  %v42_v11 = vld [vmem:[%s1269_s1 + $0x90] sm:$0xff]  ;;  %v156_v48 = vunpack.c.l.s4 %v824_v47 }
   0x2   :  { %v72_v2 = vld [vmem:[%s1269_s1 + $0x180] sm:$0xff]  ;;  %v663_v3 = vpack.c.bf16 %v41_v1, %v40_v0  ;;  %v73_v4 = vld [vmem:[%s1269_s1 + $0x188] sm:$0xff]  ;;  %v43_v13 = vld [vmem:[%s1269_s1 + $0x98] sm:$0xff]  ;;  %v159_v0 = vshrl.u32 %v158_v49, 7 }
   0x3   :  { %v24_v5 = vld [vmem:[%s1269_s1] sm:$0xff]  ;;  %v25_v6 = vld [vmem:[%s1269_s1 + $0x8] sm:$0xff]  ;;  %v695_v7 = vpack.c.bf16 %v73_v4, %v72_v2  ;;  %v74_v14 = vld [vmem:[%s1269_s1 + $0x190] sm:$0xff]  ;;  %v667_v16 = vpack.c.bf16 %v43_v13, %v42_v11  ;;  %v157_v63 = vunpack.c.0.s8 %v156_v48 }
   0x4   :  { %v665_v8 = vpack.c.bf16 %v25_v6, %v24_v5  ;;  %v56_v9 = vld [vmem:[%s1269_s1 + $0x100] sm:$0xff]  ;;  %v57_v10 = vld [vmem:[%s1269_s1 + $0x108] sm:$0xff]  ;;  %664 = vmatprep.subr.bf16.mxu0 %v663_v3  ;;  %v75_v15 = vld [vmem:[%s1269_s1 + $0x198] sm:$0xff] }
   0x5   :  { %v697_v12 = vpack.c.bf16 %v57_v10, %v56_v9  ;;  %696 = vmatprep.subr.bf16.mxu1 %v695_v7  ;;  %v699_v17 = vpack.c.bf16 %v75_v15, %v74_v14  ;;  %v26_v18 = vld [vmem:[%s1269_s1 + $0x10] sm:$0xff]  ;;  %v27_v19 = vld [vmem:[%s1269_s1 + $0x18] sm:$0xff]  ;;  %v44_v23 = vld [vmem:[%s1269_s1 + $0xa0] sm:$0xff]  ;;  %v998_v13 = vsub.s32 %v157_v63, %v159_v0 }
   0x6   :  { %666 = vmatpush3.bf16.msra.mxu0 %v665_v8  ;;  %v58_v20 = vld [vmem:[%s1269_s1 + $0x110] sm:$0xff]  ;;  %v669_v21 = vpack.c.bf16 %v27_v19, %v26_v18  ;;  %v59_v22 = vld [vmem:[%s1269_s1 + $0x118] sm:$0xff]  ;;  %v45_v24 = vld [vmem:[%s1269_s1 + $0xa8] sm:$0xff] }
   0x7   :  { %698 = vmatpush3.bf16.msra.mxu1 %v697_v12  ;;  %668 = vmatprep.subr.bf16.mxu0 %v667_v16  ;;  %v701_v25 = vpack.c.bf16 %v59_v22, %v58_v20  ;;  %v671_v26 = vpack.c.bf16 %v45_v24, %v44_v23  ;;  %v76_v27 = vld [vmem:[%s1269_s1 + $0x1a0] sm:$0xff]  ;;  %v77_v28 = vld [vmem:[%s1269_s1 + $0x1a8] sm:$0xff]  ;;  %v46_v35 = vld [vmem:[%s1269_s1 + $0xb0] sm:$0xff] }
   0x8   :  { %700 = vmatprep.subr.bf16.mxu1 %v699_v17  ;;  %v28_v29 = vld [vmem:[%s1269_s1 + $0x20] sm:$0xff]  ;;  %v703_v30 = vpack.c.bf16 %v77_v28, %v76_v27  ;;  %v29_v31 = vld [vmem:[%s1269_s1 + $0x28] sm:$0xff]  ;;  %v47_v36 = vld [vmem:[%s1269_s1 + $0xb8] sm:$0xff] }
   0x9   :  { %v60_v32 = vld [vmem:[%s1269_s1 + $0x120] sm:$0xff]  ;;  %v61_v33 = vld [vmem:[%s1269_s1 + $0x128] sm:$0xff]  ;;  %v673_v34 = vpack.c.bf16 %v29_v31, %v28_v29  ;;  %v78_v37 = vld [vmem:[%s1269_s1 + $0x1b0] sm:$0xff]  ;;  %v675_v39 = vpack.c.bf16 %v47_v36, %v46_v35 }
   0xa   :  { %670 = vmatpush3.bf16.msra.mxu0 %v669_v21  ;;  %v705_v38 = vpack.c.bf16 %v61_v33, %v60_v32  ;;  %v79_v40 = vld [vmem:[%s1269_s1 + $0x1b8] sm:$0xff]  ;;  %v30_v41 = vld [vmem:[%s1269_s1 + $0x30] sm:$0xff]  ;;  %v48_v46 = vld [vmem:[%s1269_s1 + $0xc0] sm:$0xff] }
   0xb   :  { %702 = vmatpush3.bf16.msra.mxu1 %v701_v25  ;;  %672 = vmatprep.subr.bf16.mxu0 %v671_v26  ;;  %v31_v42 = vld [vmem:[%s1269_s1 + $0x38] sm:$0xff]  ;;  %v707_v43 = vpack.c.bf16 %v79_v40, %v78_v37  ;;  %v62_v44 = vld [vmem:[%s1269_s1 + $0x130] sm:$0xff]  ;;  %v49_v50 = vld [vmem:[%s1269_s1 + $0xc8] sm:$0xff] }
   0xc   :  { %704 = vmatprep.subr.bf16.mxu1 %v703_v30  ;;  %v63_v45 = vld [vmem:[%s1269_s1 + $0x138] sm:$0xff]  ;;  %v80_v51 = vld [vmem:[%s1269_s1 + $0x1c0] sm:$0xff]  ;;  %v81_v52 = vld [vmem:[%s1269_s1 + $0x1c8] sm:$0xff]  ;;  %v677_v53 = vpack.c.bf16 %v31_v42, %v30_v41  ;;  %v679_v55 = vpack.c.bf16 %v49_v50, %v48_v46 }
   0xd   :  { %v709_v54 = vpack.c.bf16 %v63_v45, %v62_v44  ;;  %v32_v56 = vld [vmem:[%s1269_s1 + $0x40] sm:$0xff]  ;;  %v33_v57 = vld [vmem:[%s1269_s1 + $0x48] sm:$0xff]  ;;  %v711_v59 = vpack.c.bf16 %v81_v52, %v80_v51  ;;  %v50_v61 = vld [vmem:[%s1269_s1 + $0xd0] sm:$0xff] }
   0xe   :  { %674 = vmatpush3.bf16.msra.mxu0 %v673_v34  ;;  %v64_v58 = vld [vmem:[%s1269_s1 + $0x140] sm:$0xff]  ;;  %v65_v60 = vld [vmem:[%s1269_s1 + $0x148] sm:$0xff]  ;;  %v51_v62 = vld [vmem:[%s1269_s1 + $0xd8] sm:$0xff]  ;;  %v681_v3 = vpack.c.bf16 %v33_v57, %v32_v56 }
   0xf   :  { %706 = vmatpush3.bf16.msra.mxu1 %v705_v38  ;;  %676 = vmatprep.subr.bf16.mxu0 %v675_v39  ;;  %v82_v1 = vld [vmem:[%s1269_s1 + $0x1d0] sm:$0xff]  ;;  %v83_v2 = vld [vmem:[%s1269_s1 + $0x1d8] sm:$0xff]  ;;  %v713_v4 = vpack.c.bf16 %v65_v60, %v64_v58  ;;  %v683_v5 = vpack.c.bf16 %v51_v62, %v50_v61  ;;  %v52_v11 = vld [vmem:[%s1269_s1 + $0xe0] sm:$0xff] }
  0x10   :  { %708 = vmatprep.subr.bf16.mxu1 %v707_v43  ;;  %v34_v6 = vld [vmem:[%s1269_s1 + $0x50] sm:$0xff]  ;;  %v35_v7 = vld [vmem:[%s1269_s1 + $0x58] sm:$0xff]  ;;  %v715_v9 = vpack.c.bf16 %v83_v2, %v82_v1  ;;  %v53_v12 = vld [vmem:[%s1269_s1 + $0xe8] sm:$0xff] }
  0x11   :  { %v66_v8 = vld [vmem:[%s1269_s1 + $0x150] sm:$0xff]  ;;  %v67_v10 = vld [vmem:[%s1269_s1 + $0x158] sm:$0xff]  ;;  %v84_v14 = vld [vmem:[%s1269_s1 + $0x1e0] sm:$0xff]  ;;  %v685_v16 = vpack.c.bf16 %v35_v7, %v34_v6  ;;  %v687_v19 = vpack.c.bf16 %v53_v12, %v52_v11 }
  0x12   :  { %678 = vmatpush3.bf16.msra.mxu0 %v677_v53  ;;  %v85_v15 = vld [vmem:[%s1269_s1 + $0x1e8] sm:$0xff]  ;;  %v36_v17 = vld [vmem:[%s1269_s1 + $0x60] sm:$0xff]  ;;  %v717_v18 = vpack.c.bf16 %v67_v10, %v66_v8  ;;  %v54_v25 = vld [vmem:[%s1269_s1 + $0xf0] sm:$0xff] }
  0x13   :  { %710 = vmatpush3.bf16.msra.mxu1 %v709_v54  ;;  %680 = vmatprep.subr.bf16.mxu0 %v679_v55  ;;  %v37_v20 = vld [vmem:[%s1269_s1 + $0x68] sm:$0xff]  ;;  %v68_v21 = vld [vmem:[%s1269_s1 + $0x160] sm:$0xff]  ;;  %v719_v23 = vpack.c.bf16 %v85_v15, %v84_v14  ;;  %v55_v26 = vld [vmem:[%s1269_s1 + $0xf8] sm:$0xff] }
  0x14   :  { %712 = vmatprep.subr.bf16.mxu1 %v711_v59  ;;  %v21_v22 = vld [vmem:[%s1268_s0] sm:$0xff]  ;;  %v69_v24 = vld [vmem:[%s1269_s1 + $0x168] sm:$0xff]  ;;  %v86_v29 = vld [vmem:[%s1269_s1 + $0x1f0] sm:$0xff]  ;;  %v689_v31 = vpack.c.bf16 %v37_v20, %v36_v17  ;;  %v691_v35 = vpack.c.bf16 %v55_v26, %v54_v25 }
  0x15   :  { %v161_v27 = vrot.slane %v21_v22, %v998_v13  ;;  %v154_v28 = vcombine.high %v21_v22, %v21_v22  ;;  %v87_v30 = vld [vmem:[%s1269_s1 + $0x1f8] sm:$0xff]  ;;  %v721_v34 = vpack.c.bf16 %v69_v24, %v68_v21  ;;  %v38_v36 = vld [vmem:[%s1269_s1 + $0x70] sm:$0xff]  ;;  %v104_v42 = vld [vmem:[%s1269_s1 + $0x280] sm:$0xff] }
  0x16   :  { %682 = vmatpush3.bf16.msra.mxu0 %v681_v3  ;;  %v39_v37 = vld [vmem:[%s1269_s1 + $0x78] sm:$0xff]  ;;  %v70_v38 = vld [vmem:[%s1269_s1 + $0x170] sm:$0xff]  ;;  %v723_v39 = vpack.c.bf16 %v87_v30, %v86_v29  ;;  %v105_v43 = vld [vmem:[%s1269_s1 + $0x288] sm:$0xff] }
  0x17   :  { %714 = vmatpush3.bf16.msra.mxu1 %v713_v4  ;;  %684 = vmatprep.subr.bf16.mxu0 %v683_v5  ;;  %v169_v32 = vcombine.high %v161_v27, %v161_v27  ;;  %v168_v33 = vrot.slane %v154_v28, %v998_v13  ;;  %v71_v40 = vld [vmem:[%s1269_s1 + $0x178] sm:$0xff]  ;;  %v136_v44 = vld [vmem:[%s1269_s1 + $0x380] sm:$0xff]  ;;  %v137_v45 = vld [vmem:[%s1269_s1 + $0x388] sm:$0xff]  ;;  %v693_v46 = vpack.c.bf16 %v39_v37, %v38_v36 }
  0x18   :  { %716 = vmatprep.subr.bf16.mxu1 %v715_v9  ;;  %v725_v47 = vpack.c.bf16 %v71_v40, %v70_v38  ;;  %v727_v48 = vpack.c.bf16 %v105_v43, %v104_v42  ;;  %v88_v50 = vld [vmem:[%s1269_s1 + $0x200] sm:$0xff]  ;;  %v89_v51 = vld [vmem:[%s1269_s1 + $0x208] sm:$0xff]  ;;  %v759_v53 = vpack.c.bf16 %v137_v45, %v136_v44  ;;  %v106_v55 = vld [vmem:[%s1269_s1 + $0x290] sm:$0xff] }
  0x19   :  { %260 = vmatprep.mubr.f32.mxu0 %v169_v32  ;;  %v170_v41 = vcombine.high %v168_v33, %v168_v33  ;;  %v120_v52 = vld [vmem:[%s1269_s1 + $0x300] sm:$0xff]  ;;  %v121_v54 = vld [vmem:[%s1269_s1 + $0x308] sm:$0xff]  ;;  %v107_v56 = vld [vmem:[%s1269_s1 + $0x298] sm:$0xff]  ;;  %v729_v59 = vpack.c.bf16 %v89_v51, %v88_v50 }
  0x1a   :  { %686 = vmatpush3.bf16.msra.mxu0 %v685_v16  ;;  %v138_v57 = vld [vmem:[%s1269_s1 + $0x390] sm:$0xff]  ;;  %v139_v58 = vld [vmem:[%s1269_s1 + $0x398] sm:$0xff]  ;;  %v761_v60 = vpack.c.bf16 %v121_v54, %v120_v52  ;;  %v731_v61 = vpack.c.bf16 %v107_v56, %v106_v55  ;;  %v108_v3 = vld [vmem:[%s1269_s1 + $0x2a0] sm:$0xff] }
  0x1b   :  { %718 = vmatpush3.bf16.msra.mxu1 %v717_v18  ;;  %688 = vmatprep.subr.bf16.mxu0 %v687_v19  ;;  %v90_v62 = vld [vmem:[%s1269_s1 + $0x210] sm:$0xff]  ;;  %v91_v63 = vld [vmem:[%s1269_s1 + $0x218] sm:$0xff]  ;;  %v763_v1 = vpack.c.bf16 %v139_v58, %v138_v57  ;;  %v109_v4 = vld [vmem:[%s1269_s1 + $0x2a8] sm:$0xff] }
  0x1c   :  { %720 = vmatprep.subr.bf16.mxu1 %v719_v23  ;;  %330 = vmatprep.mubr.f32.mxu1 %v170_v41  ;;  %v122_v0 = vld [vmem:[%s1269_s1 + $0x310] sm:$0xff]  ;;  %v123_v2 = vld [vmem:[%s1269_s1 + $0x318] sm:$0xff]  ;;  %v140_v5 = vld [vmem:[%s1269_s1 + $0x3a0] sm:$0xff]  ;;  %v733_v7 = vpack.c.bf16 %v91_v63, %v90_v62  ;;  %v735_v9 = vpack.c.bf16 %v109_v4, %v108_v3 }
  0x1d   :  { %v141_v6 = vld [vmem:[%s1269_s1 + $0x3a8] sm:$0xff]  ;;  %v765_v8 = vpack.c.bf16 %v123_v2, %v122_v0  ;;  %v92_v10 = vld [vmem:[%s1269_s1 + $0x220] sm:$0xff]  ;;  %v110_v16 = vld [vmem:[%s1269_s1 + $0x2b0] sm:$0xff] }
  0x1e   :  { %690 = vmatpush3.bf16.msra.mxu0 %v689_v31  ;;  %v93_v11 = vld [vmem:[%s1269_s1 + $0x228] sm:$0xff]  ;;  %v124_v12 = vld [vmem:[%s1269_s1 + $0x320] sm:$0xff]  ;;  %v767_v14 = vpack.c.bf16 %v141_v6, %v140_v5  ;;  %v111_v17 = vld [vmem:[%s1269_s1 + $0x2b8] sm:$0xff] }
  0x1f   :  { %722 = vmatpush3.bf16.msra.mxu1 %v721_v34  ;;  %692 = vmatprep.subr.bf16.mxu0 %v691_v35  ;;  %v125_v15 = vld [vmem:[%s1269_s1 + $0x328] sm:$0xff]  ;;  %v142_v18 = vld [vmem:[%s1269_s1 + $0x3b0] sm:$0xff]  ;;  %v143_v19 = vld [vmem:[%s1269_s1 + $0x3b8] sm:$0xff]  ;;  %v737_v20 = vpack.c.bf16 %v93_v11, %v92_v10  ;;  %v739_v23 = vpack.c.bf16 %v111_v17, %v110_v16 }
  0x20   :  { %724 = vmatprep.subr.bf16.mxu1 %v723_v39  ;;  %v94_v21 = vld [vmem:[%s1269_s1 + $0x230] sm:$0xff]  ;;  %v769_v22 = vpack.c.bf16 %v125_v15, %v124_v12  ;;  %v95_v24 = vld [vmem:[%s1269_s1 + $0x238] sm:$0xff]  ;;  %v112_v28 = vld [vmem:[%s1269_s1 + $0x2c0] sm:$0xff] }
  0x21   :  { %v126_v25 = vld [vmem:[%s1269_s1 + $0x330] sm:$0xff]  ;;  %v127_v26 = vld [vmem:[%s1269_s1 + $0x338] sm:$0xff]  ;;  %v113_v29 = vld [vmem:[%s1269_s1 + $0x2c8] sm:$0xff] }
  0x22   :  { %694 = vmatpush3.bf16.msra.mxu0 %v693_v46  ;;  %v144_v30 = vld [vmem:[%s1269_s1 + $0x3c0] sm:$0xff]  ;;  %v145_v31 = vld [vmem:[%s1269_s1 + $0x3c8] sm:$0xff] }
  0x23   :  { %726 = vmatpush3.bf16.msra.mxu1 %v725_v47  ;;  %728 = vmatprep.subr.bf16.mxu0 %v727_v48  ;;  %v22_v32 = vld [vmem:[%s1268_s0 + $0x8] sm:$0xff] }
  0x24   :  { %760 = vmatprep.subr.bf16.mxu1 %v759_v53 }
  0x25   :  { %261 = vmatmul.mubr.f32.vlgmr.msra.gmra.mrb[0].mxu0 %v161_v27  ;;  %v771_v27 = vpack.c.bf16 %v143_v19, %v142_v18 }
  0x26   :  { %331 = vmatmul.mubr.f32.vlgmr.msra.gmra.mrb[0].mxu1 %v168_v33  ;;  %730 = vmatpush3.bf16.msra.mxu0 %v729_v59 }
  0x27   :  { %762 = vmatpush3.bf16.msra.mxu1 %v761_v60  ;;  %732 = vmatprep.subr.bf16.mxu0 %v731_v61 }
  0x28   :  { %764 = vmatprep.subr.bf16.mxu1 %v763_v1 }
  0x2a   :  { %734 = vmatpush3.bf16.msra.mxu0 %v733_v7 }
  0x2b   :  { %766 = vmatpush3.bf16.msra.mxu1 %v765_v8  ;;  %736 = vmatprep.subr.bf16.mxu0 %v735_v9 }
  0x2c   :  { %768 = vmatprep.subr.bf16.mxu1 %v767_v14 }
  0x2d   :  { %8 = vsyncpa [#allocation4], 0  ;;  %v741_v33 = vpack.c.bf16 %v95_v24, %v94_v21  ;;  %v1159_v34 = vrot.slane %v22_v32, %v998_v13  ;;  %v171_v35 = vcombine.high %v22_v32, %v22_v32  ;;  %v773_v36 = vpack.c.bf16 %v127_v26, %v126_v25  ;;  %v96_v38 = vld [vmem:[%s1269_s1 + $0x240] sm:$0xff]  ;;  %v97_v39 = vld [vmem:[%s1269_s1 + $0x248] sm:$0xff]  ;;  %s826_s28 = smov [#allocation3]  }
  0x2e   :  { %738 = vmatpush3.bf16.msra.mxu0 %v737_v20  ;;  %v743_v37 = vpack.c.bf16 %v113_v29, %v112_v28  ;;  %v128_v40 = vld [vmem:[%s1269_s1 + $0x340] sm:$0xff]  ;;  %v775_v41 = vpack.c.bf16 %v145_v31, %v144_v30  ;;  %v129_v42 = vld [vmem:[%s1269_s1 + $0x348] sm:$0xff]  ;;  %v114_v43 = vld [vmem:[%s1269_s1 + $0x2d0] sm:$0xff]  ;;  %v745_v50 = vpack.c.bf16 %v97_v39, %v96_v38  ;;  %vm19_vm0 = vcmask 17408   ;;  %s514_s29 = sshll.u32 %s826_s28, 4  ;;  %s515_s29 = int_to_ptr.vmem [resolvable:$true] %s514_s29 }
  0x2f   :  { %770 = vmatpush3.bf16.msra.mxu1 %v769_v22  ;;  %740 = vmatprep.subr.bf16.mxu0 %v739_v23  ;;  %v115_v44 = vld [vmem:[%s1269_s1 + $0x2d8] sm:$0xff]  ;;  %v186_v45 = vcombine.high %v1159_v34, %v1159_v34  ;;  %v185_v46 = vrot.slane %v171_v35, %v998_v13  ;;  %v146_v47 = vld [vmem:[%s1269_s1 + $0x3d0] sm:$0xff]  ;;  %v777_v52 = vpack.c.bf16 %v129_v42, %v128_v40  ;;  %v116_v58 = vld [vmem:[%s1269_s1 + $0x2e0] sm:$0xff]  ;;  %v825_v21 = vmov 0.0   ;;  %p805_p1 = scmp.lt.s32.totalorder %s515_s29, %s515_s29 }
  0x30   :  { %772 = vmatprep.subr.bf16.mxu1 %v771_v27  ;;  %v147_v48 = vld [vmem:[%s1269_s1 + $0x3d8] sm:$0xff]  ;;  %v747_v53 = vpack.c.bf16 %v115_v44, %v114_v43  ;;  %v98_v13 = vld [vmem:[%s1269_s1 + $0x250] sm:$0xff]  ;;  %v117_v59 = vld [vmem:[%s1269_s1 + $0x2e8] sm:$0xff]  ;;  %20 = vst.msk [vmem:[#allocation2] sm:$0x3] %vm19_vm0, %v825_v21  ;;  %vm506_vm2 = vcmask 9216  }
  0x31   :  { %400 = vmatprep.mubr.f32.mxu0 %v186_v45  ;;  %v187_v51 = vcombine.high %v185_v46, %v185_v46  ;;  %v99_v54 = vld [vmem:[%s1269_s1 + $0x258] sm:$0xff]  ;;  %v130_v55 = vld [vmem:[%s1269_s1 + $0x350] sm:$0xff]  ;;  %v779_v56 = vpack.c.bf16 %v147_v48, %v146_v47  ;;  %v148_v60 = vld [vmem:[%s1269_s1 + $0x3e0] sm:$0xff]  ;;  %v751_v0 = vpack.c.bf16 %v117_v59, %v116_v58  ;;  %v503_v48 = vand.u32 127, %v158_v49 }
  0x32   :  { %742 = vmatpush3.bf16.msra.mxu0 %v741_v33  ;;  %v131_v57 = vld [vmem:[%s1269_s1 + $0x358] sm:$0xff]  ;;  %v149_v61 = vld [vmem:[%s1269_s1 + $0x3e8] sm:$0xff]  ;;  %v749_v62 = vpack.c.bf16 %v99_v54, %v98_v13  ;;  %v100_v1 = vld [vmem:[%s1269_s1 + $0x260] sm:$0xff] }
  0x33   :  { %774 = vmatpush3.bf16.msra.mxu1 %v773_v36  ;;  %744 = vmatprep.subr.bf16.mxu0 %v743_v37  ;;  %v781_v63 = vpack.c.bf16 %v131_v57, %v130_v55  ;;  %v101_v2 = vld [vmem:[%s1269_s1 + $0x268] sm:$0xff]  ;;  %v132_v3 = vld [vmem:[%s1269_s1 + $0x360] sm:$0xff]  ;;  %v783_v4 = vpack.c.bf16 %v149_v61, %v148_v60  ;;  %v118_v6 = vld [vmem:[%s1269_s1 + $0x2f0] sm:$0xff]  ;;  %vm504_vm1 = vcmp.eq.s32.totalorder %v503_v48, 1 }
  0x34   :  { %776 = vmatprep.subr.bf16.mxu1 %v775_v41  ;;  %470 = vmatprep.mubr.f32.mxu1 %v187_v51  ;;  %v133_v5 = vld [vmem:[%s1269_s1 + $0x368] sm:$0xff]  ;;  %v119_v7 = vld [vmem:[%s1269_s1 + $0x2f8] sm:$0xff]  ;;  %v150_v8 = vld [vmem:[%s1269_s1 + $0x3f0] sm:$0xff]  ;;  %v753_v10 = vpack.c.bf16 %v101_v2, %v100_v1 }
  0x35   :  { %v151_v9 = vld [vmem:[%s1269_s1 + $0x3f8] sm:$0xff]  ;;  %v785_v11 = vpack.c.bf16 %v133_v5, %v132_v3  ;;  %v755_v12 = vpack.c.bf16 %v119_v7, %v118_v6  ;;  %v102_v14 = vld [vmem:[%s1269_s1 + $0x270] sm:$0xff]  ;;  %v522_v39 = vld [vmem:[%s1270_s2] ss:$0 sm:$0xff]  ;;  %s800_s2 = scalar_lea.vmem %s515_s29, 32 }
  0x36   :  { %746 = vmatpush3.bf16.msra.mxu0 %v745_v50  ;;  %v103_v15 = vld [vmem:[%s1269_s1 + $0x278] sm:$0xff]  ;;  %v787_v16 = vpack.c.bf16 %v151_v9, %v150_v8  ;;  %v134_v17 = vld [vmem:[%s1269_s1 + $0x370] sm:$0xff]  ;;  %p801_p0 = scmp.ne.s32.totalorder %s515_s29, %s800_s2  ;;  %p806_p2 = scmp.lt.s32.totalorder %s800_s2, %s800_s2 }
  0x37   :  { %778 = vmatpush3.bf16.msra.mxu1 %v777_v52  ;;  %748 = vmatprep.subr.bf16.mxu0 %v747_v53  ;;  %v135_v18 = vld [vmem:[%s1269_s1 + $0x378] sm:$0xff]  ;;  %v757_v19 = vpack.c.bf16 %v103_v15, %v102_v14 }
  0x38   :  { %780 = vmatprep.subr.bf16.mxu1 %v779_v56  ;;  %v789_v20 = vpack.c.bf16 %v135_v18, %v134_v17  ;;  %p807_p3 = por %p806_p2, %p805_p1 }
  0x3a   :  { %750 = vmatpush3.bf16.msra.mxu0 %v749_v62  ;;  %p808_p4 = pnand %p807_p3, %p801_p0 }
  0x3b   :  { %782 = vmatpush3.bf16.msra.mxu1 %v781_v63  ;;  %752 = vmatprep.subr.bf16.mxu0 %v751_v0 }
  0x3c   :  { %784 = vmatprep.subr.bf16.mxu1 %v783_v4 }
  0x3e   :  { %754 = vmatpush3.bf16.msra.mxu0 %v753_v10 }
  0x3f   :  { %786 = vmatpush3.bf16.msra.mxu1 %v785_v11  ;;  %756 = vmatprep.subr.bf16.mxu0 %v755_v12 }
  0x40   :  { %788 = vmatprep.subr.bf16.mxu1 %v787_v16 }
  0x42   :  { %758 = vmatpush3.bf16.msra.mxu0 %v757_v19 }
  0x43   :  { %790 = vmatpush3.bf16.msra.mxu1 %v789_v20 }
  0x45   :  { %401 = vmatmul.mubr.f32.vlgmr.msra.gmra.mrb[2].mxu0 %v1159_v34  ;;  %v23_v34 = vld [vmem:[#allocation2] sm:$0x3] }
  0x46   :  { %471 = vmatmul.mubr.f32.vlgmr.msra.gmra.mrb[2].mxu1 %v185_v46 }
  0xf8   :  { %v555_v22 = vpop.f32.mrb[0].mxu0 }
  0xf9   :  { %v590_v23 = vpop.f32.mrb[0].mxu1  ;;  %v556_v24 = vpop.f32.mrb[1].mxu0 }
  0xfa   :  { %v557_v25 = vadd.f32 %v556_v24, %v555_v22  ;;  %v591_v26 = vpop.f32.mrb[1].mxu1 }
  0xfb   :  { %v592_v27 = vadd.f32 %v591_v26, %v590_v23 }
  0xfd   :  { %v333_v28 = vadd.f32 %v592_v27, %v557_v25 }
 0x118   :  { %v625_v29 = vpop.f32.mrb[2].mxu0 }
 0x119   :  { %v626_v30 = vpop.f32.mrb[3].mxu0  ;;  %v660_v31 = vpop.f32.mrb[2].mxu1 }
 0x11a   :  { %v627_v32 = vadd.f32 %v626_v30, %v625_v29  ;;  %v661_v33 = vpop.f32.mrb[3].mxu1 }
 0x11b   :  { %v662_v35 = vadd.f32 %v661_v33, %v660_v31 }
 0x11c   :  { %v403_v36 = vadd.f32 %v627_v32, %v333_v28 }
 0x11e   :  { %v473_v37 = vadd.f32 %v662_v35, %v403_v36 }
 0x120   :  { %v476_v38 = vadd.f32 %v473_v37, %v23_v34 }
 0x122   :  { %478 = vst.msk [vmem:[#allocation2] sm:$0x3] %vm19_vm0, %v476_v38 }
 0x129   :  { %v482_v40 = vld [vmem:[#allocation2] sm:$0x3] }
 0x12a   :  { %v490_v41 = vadd.f32 %v522_v39, %v482_v40 }
 0x12c   :  { %v491_v42 = vsub.f32 0.0, %v490_v41 }
 0x12e   :  { %v492_v43 = vmul.f32 1.442695, %v491_v42 }
 0x130   :  { %796 = vpow2.f32 %v492_v43 }
 0x13a   :  { %v797_v44 = vpop.eup %796 }
 0x13b   :  { %v494_v45 = vadd.f32 1.0, %v797_v44 }
 0x13d   :  { %798 = vrcp.f32 %v494_v45 }
 0x147   :  { %v799_v46 = vpop.eup %798 }
 0x148   :  { %v497_v47 = vsel %vm19_vm0, %v799_v46, 0.0 }
 0x149   :  { %498 = vadd.xlane.f32.xlu0 %v497_v47 }
 0x1d6   :  { %v499_v50 = vpop.xlane.xlu0 %498 }
 0x1d7   :  { %v500_v51 = vmul.f32 0.33333334, %v499_v50 }
 0x1d9   :  { %v501_v52 = vsub.f32 1.0, %v500_v51 }
 0x1db   :  { %v505_v53 = vsel %vm504_vm1, %v500_v51, %v501_v52 }
 0x1dc   :  { %507 = vst.msk [vmem:[#allocation3] sm:$0x3] %vm506_vm2, %v505_v53 }
 0x1dd   :  { %811 = shalt.err (!%p808_p4)
}
 0x1de   :  { %s812_s4 = scalar_lea.hbm %s1271_s3, 32 }
 0x1df   :  { %p813_p5 = scmp.ne.s32.totalorder %s1271_s3, %s812_s4  ;;  %p816_p6 = scmp.lt.u32.totalorder %s812_s4, %s1271_s3 }
 0x1e1   :  { %p818_p7 = pnand %p816_p6, %p813_p5 }
 0x1e3   :  { %821 = shalt.err (!%p818_p7)
}
 0x1e4   :  { %517 = dma.vmem_to_hbm [thread:$0]  %s515_s29, 32, %s1271_s3, [#allocation4]  }
 0x1e5   :  { %822 = dma.done.wait [#allocation4], 32  }
 0x1e6   :  { %823 = vsyncadd [#allocation4], 4294967264 }
 0x1e7   :  { %521 = vsyncpa [#allocation4], 1 }

</bundles_post_ra>
